<compile_context>
chip_gen: v7x
topology: tpu7x:2x2x1
jax: 0.10.0
libtpu: 0.0.40
codegen_flags: <defaults>
</compile_context>

<pallas_src>
import functools

import jax
import jax.numpy as jnp
from jax.experimental import pallas as pl
from jax.experimental.pallas import tpu as pltpu


def ensemble_kernel(x_ref, w_ref, b_ref, o_ref, *, n_models, d_out):
    """One grid step handles one batch tile.

    x_ref: (tb, D_in)            batch tile (bf16)
    w_ref: (D_in, N*D_out)       member-major concatenated weights (bf16), resident
    b_ref: (N, D_out)            all member biases, resident
    o_ref: (tb, D_out)           output tile (x.dtype)
    """
    # Single wide MXU matmul, f32 accumulation: [tb, D_in] @ [D_in, N*D_out].
    y = jnp.dot(x_ref[...], w_ref[...], preferred_element_type=jnp.float32)

    # Reduce the N member chunks with static, lane-aligned slices (VPU adds).
    acc = y[:, 0:d_out]
    for i in range(1, n_models):
        acc = acc + y[:, i * d_out:(i + 1) * d_out]

    # Bias handled once in the epilogue: add sum_i(b_i), then scale by 1/N.
    b_sum = jnp.sum(b_ref[...].astype(jnp.float32), axis=0, keepdims=True)
    o_ref[...] = ((acc + b_sum) * (1.0 / n_models)).astype(o_ref.dtype)


def ensemble_forward(x, weights, biases, *, compute_dtype=jnp.bfloat16, tb=None):
    """x: [B, D_in], weights: [N, D_in, D_out], biases: [N, D_out] (or [N,1,D_out])."""
    n_models, d_in, d_out = weights.shape
    b = x.shape[0]
    biases = biases.reshape(n_models, d_out)

    # Member-major concat along the lane axis: [D_in, N*D_out] (layout plumbing
    # only; lets the kernel issue one wide MXU push instead of N tiny ones).
    w_cat = jnp.transpose(weights, (1, 0, 2)).reshape(d_in, n_models * d_out)

    # Stream activations/weights at bf16; accumulate in f32 inside the kernel.
    x_c = x.astype(compute_dtype)
    w_c = w_cat.astype(compute_dtype)

    if tb is None:
        tb = b  # small problems: one batch tile; larger B -> multiple parallel tiles

    kernel = functools.partial(ensemble_kernel, n_models=n_models, d_out=d_out)

    flops = 2 * b * d_in * n_models * d_out
    bytes_accessed = (
        x_c.size * x_c.dtype.itemsize
        + w_c.size * w_c.dtype.itemsize
        + biases.size * biases.dtype.itemsize
        + b * d_out * x.dtype.itemsize
    )

    return pl.pallas_call(
        kernel,
        out_shape=jax.ShapeDtypeStruct((b, d_out), x.dtype),
        grid_spec=pltpu.PrefetchScalarGridSpec(
            num_scalar_prefetch=0,
            grid=(pl.cdiv(b, tb),),          # batch tiles (parallel axis)
            in_specs=[
                pl.BlockSpec((tb, d_in), lambda i: (i, 0)),                # x tile
                pl.BlockSpec((d_in, n_models * d_out), lambda i: (0, 0)),  # W_cat, resident
                pl.BlockSpec((n_models, d_out), lambda i: (0, 0)),         # biases, resident
            ],
            out_specs=pl.BlockSpec((tb, d_out), lambda i: (i, 0)),
        ),
        compiler_params=pltpu.CompilerParams(
            dimension_semantics=("parallel",),  # lets v7x use both TensorCores
        ),
        cost_estimate=pl.CostEstimate(
            flops=flops, transcendentals=0, bytes_accessed=bytes_accessed
        ),
    )(x_c, w_c, biases)


if __name__ == "__main__":
    # Small, deterministic synthetic setup.
    N_MODELS = 4
    B = 8        # batch
    D_IN = 32    # input features
    D_OUT = 128  # output features (lane-dense)

    key = jax.random.PRNGKey(0)
    kx, kw, kb = jax.random.split(key, 3)

    x = jax.random.normal(kx, (B, D_IN), dtype=jnp.float32)
    weights = jax.random.normal(kw, (N_MODELS, D_IN, D_OUT), dtype=jnp.float32) * 0.05
    biases = jax.random.normal(kb, (N_MODELS, D_OUT), dtype=jnp.float32) * 0.05

    out = ensemble_forward(x, weights, biases)
    out = jax.block_until_ready(out)

    # Pure-JAX reference: mean over members of (x @ W_i + b_i), evaluated on the
    # same bf16-rounded operands the kernel streams (accumulation in f32).
    xb = x.astype(jnp.bfloat16).astype(jnp.float32)
    wb = weights.astype(jnp.bfloat16).astype(jnp.float32)
    ref = jnp.mean(jnp.einsum("bi,nio->nbo", xb, wb) + biases[:, None, :], axis=0)

    assert out.shape == (B, D_OUT), out.shape
    assert jnp.allclose(out, ref, atol=5e-4, rtol=5e-4), "mismatch vs reference"

    print("KERNEL_OK")
</pallas_src>

<mosaic_0001>
module attributes {stable_mosaic.version = 11 : i64} {
  func.func @ensemble_kernel(%arg0: i32, %arg1: memref<8x32xbf16, #tpu.memory_space<vmem>>, %arg2: memref<32x512xbf16, #tpu.memory_space<vmem>>, %arg3: memref<4x128xf32, #tpu.memory_space<vmem>>, %arg4: memref<8x128xf32, #tpu.memory_space<vmem>>) attributes {dimension_semantics = [#tpu.dimension_semantics<parallel>], iteration_bounds = array<i64: 1>, scalar_prefetch = 0 : i64, scratch_operands = 0 : i64, tpu.core_type = #tpu.core_type<tc>, window_params = [{transform_indices = @transform_0, window_bounds = array<i64: 8, 32>}, {pipeline_mode = #tpu.pipeline_mode<synchronous>, transform_indices = @transform_1, window_bounds = array<i64: 32, 512>}, {pipeline_mode = #tpu.pipeline_mode<synchronous>, transform_indices = @transform_2, window_bounds = array<i64: 4, 128>}, {transform_indices = @transform_3, window_bounds = array<i64: 8, 128>}]} {
    %c0 = arith.constant 0 : index
    %c0_0 = arith.constant 0 : index
    %0 = vector.load %arg1[%c0, %c0_0] : memref<8x32xbf16, #tpu.memory_space<vmem>>, vector<8x32xbf16>
    %c0_1 = arith.constant 0 : index
    %c0_2 = arith.constant 0 : index
    %1 = vector.load %arg2[%c0_1, %c0_2] : memref<32x512xbf16, #tpu.memory_space<vmem>>, vector<32x512xbf16>
    %cst = arith.constant dense<0.000000e+00> : vector<8x512xf32>
    %2 = tpu.matmul %0, %1, %cst {dimension_numbers = #tpu.dot_dimension_numbers<[1], [0], [0], [1], [0, 0, 1, 1], [], []>} : vector<8x32xbf16>, vector<32x512xbf16>, vector<8x512xf32> -> vector<8x512xf32>
    %3 = vector.extract_strided_slice %2 {offsets = [0, 0], sizes = [8, 128], strides = [1, 1]} : vector<8x512xf32> to vector<8x128xf32>
    %4 = vector.extract_strided_slice %2 {offsets = [0, 128], sizes = [8, 128], strides = [1, 1]} : vector<8x512xf32> to vector<8x128xf32>
    %5 = arith.addf %3, %4 : vector<8x128xf32>
    %6 = vector.extract_strided_slice %2 {offsets = [0, 256], sizes = [8, 128], strides = [1, 1]} : vector<8x512xf32> to vector<8x128xf32>
    %7 = arith.addf %5, %6 : vector<8x128xf32>
    %8 = vector.extract_strided_slice %2 {offsets = [0, 384], sizes = [8, 128], strides = [1, 1]} : vector<8x512xf32> to vector<8x128xf32>
    %9 = arith.addf %7, %8 : vector<8x128xf32>
    %c0_3 = arith.constant 0 : index
    %c0_4 = arith.constant 0 : index
    %10 = vector.load %arg3[%c0_3, %c0_4] : memref<4x128xf32, #tpu.memory_space<vmem>>, vector<4x128xf32>
    %cst_5 = arith.constant dense<0.000000e+00> : vector<128xf32>
    %11 = vector.multi_reduction <add>, %10, %cst_5 [0] : vector<4x128xf32> to vector<128xf32>
    %12 = vector.shape_cast %11 : vector<128xf32> to vector<1x128xf32>
    %13 = vector.broadcast %12 : vector<1x128xf32> to vector<8x128xf32>
    %14 = arith.addf %9, %13 : vector<8x128xf32>
    %cst_6 = arith.constant 2.500000e-01 : f32
    %15 = vector.broadcast %cst_6 : f32 to vector<8x128xf32>
    %16 = arith.mulf %14, %15 : vector<8x128xf32>
    %c0_7 = arith.constant 0 : index
    %c0_8 = arith.constant 0 : index
    %17 = vector.load %arg4[%c0_7, %c0_8] : memref<8x128xf32, #tpu.memory_space<vmem>>, vector<8x128xf32>
    tpu.vector_store %arg4[%c0_7, %c0_8], %16 {strides = array<i32>} : memref<8x128xf32, #tpu.memory_space<vmem>>, vector<8x128xf32>,
    return
  }
  func.func @transform_0(%arg0: i32) -> (i32, i32) {
    %c0_i32 = arith.constant 0 : i32
    %c0_i32_0 = arith.constant 0 : i32
    return %arg0, %c0_i32 : i32, i32
  }
  func.func @transform_1(%arg0: i32) -> (i32, i32) {
    %c0_i32 = arith.constant 0 : i32
    %c0_i32_0 = arith.constant 0 : i32
    %c0_i32_1 = arith.constant 0 : i32
    return %c0_i32, %c0_i32_0 : i32, i32
  }
  func.func @transform_2(%arg0: i32) -> (i32, i32) {
    %c0_i32 = arith.constant 0 : i32
    %c0_i32_0 = arith.constant 0 : i32
    %c0_i32_1 = arith.constant 0 : i32
    return %c0_i32, %c0_i32_0 : i32, i32
  }
  func.func @transform_3(%arg0: i32) -> (i32, i32) {
    %c0_i32 = arith.constant 0 : i32
    %c0_i32_0 = arith.constant 0 : i32
    return %arg0, %c0_i32 : i32, i32
  }
}

</mosaic_0001>

<bundles_post_ra>
// kernel: tpu_custom_call.1
= control target key start
LH: loop header
LB: loop body
LE: loop exit
PB: predicated region body
PF: predicated region fallthrough
CT: control target
= control target key end

     0   :  { %8 = vsyncpa [#allocation3], 0  ;;  %s380_s0 = inlined_call_operand.hbm [shape: bf16[8,32], index: 0, kind: input, shape index: {}]   ;;  %s381_s1 = inlined_call_operand.hbm [shape: bf16[32,512], index: 1, kind: input, shape index: {}]   ;;  %s382_s2 = inlined_call_operand.vmem [shape: f32[4,128], index: 2, kind: input, shape index: {}]   ;;  %s383_s3 = inlined_call_operand.hbm [shape: f32[8,128], index: 3, kind: output, shape index: {}]  }
   0x1   :  { %9 = vsyncpa [#allocation6], 0 }
   0x2   :  { %10 = vsyncpa [#allocation4], 0  ;;  %s308_s12 = smov [#allocation2]   ;;  %s309_s14 = smov [#allocation5]  }
   0x3   :  { %s17_s13 = sshll.u32 %s308_s12, 4  ;;  %s26_s15 = sshll.u32 %s309_s14, 4  ;;  %s18_s13 = int_to_ptr.vmem [resolvable:$true] %s17_s13  ;;  %s334_s15 = int_to_ptr.vmem [resolvable:$true] %s26_s15 }
   0x4   :  { %s236_s18 = scalar_lea.hbm %s380_s0, 64 }
   0x5   :  { %p237_p0 = scmp.ne.s32.totalorder %s380_s0, %s236_s18  ;;  %p240_p1 = scmp.lt.u32.totalorder %s236_s18, %s380_s0 }
   0x7   :  { %p242_p2 = pnand %p240_p1, %p237_p0 }
   0x9   :  { %245 = shalt.err (!%p242_p2)
}
   0xa   :  { %s246_s23 = scalar_lea.vmem %s18_s13, 64  ;;  %p251_p4 = scmp.lt.s32.totalorder %s18_s13, %s18_s13 }
   0xb   :  { %p247_p3 = scmp.ne.s32.totalorder %s18_s13, %s246_s23  ;;  %p252_p5 = scmp.lt.s32.totalorder %s246_s23, %s246_s23 }
   0xd   :  { %p253_p6 = por %p252_p5, %p251_p4 }
   0xf   :  { %p254_p7 = pnand %p253_p6, %p247_p3 }
  0x11   :  { %257 = shalt.err (!%p254_p7)
}
  0x12   :  { %20 = dma.hbm_to_vmem [thread:$0]  %s380_s0, 64, %s18_s13, [#allocation3]  }
  0x13   :  { %s258_s28 = scalar_lea.hbm %s381_s1, 1024 }
  0x14   :  { %p259_p8 = scmp.ne.s32.totalorder %s381_s1, %s258_s28  ;;  %p262_p9 = scmp.lt.u32.totalorder %s258_s28, %s381_s1 }
  0x16   :  { %p264_p10 = pnand %p262_p9, %p259_p8 }
  0x18   :  { %267 = shalt.err (!%p264_p10)
}
  0x19   :  { %s268_s6 = scalar_lea.vmem %s334_s15, 1024  ;;  %p273_p12 = scmp.lt.s32.totalorder %s334_s15, %s334_s15 }
  0x1a   :  { %p269_p11 = scmp.ne.s32.totalorder %s334_s15, %s268_s6  ;;  %p274_p13 = scmp.lt.s32.totalorder %s268_s6, %s268_s6 }
  0x1c   :  { %p275_p0 = por %p274_p13, %p273_p12 }
  0x1e   :  { %p276_p1 = pnand %p275_p0, %p269_p11 }
  0x20   :  { %279 = shalt.err (!%p276_p1)
}
  0x21   :  { %s310_s0 = smov 256   ;;  %s311_s7 = smov 16  }
  0x22   :  { %32 = dma.hbm_to_vmem [thread:$0]  %s381_s1, 1024, %s334_s15, [#allocation6], %s310_s0, %s310_s0, %s311_s7  }
  0x23   :  { %302 = dma.done.wait [#allocation3], 64  }
  0x24   :  { %303 = vsyncadd [#allocation3], 4294967232 }
  0x25   :  { %304 = dma.done.wait [#allocation6], 1024  }
  0x26   :  { %305 = vsyncadd [#allocation6], 4294966272  ;;  %v312_v0 = vmov 0   ;;  %v224_v1 = vld [vmem:[#allocation5 + $0x4] ss:$16 sps:$4 sm:$0xff]   ;;  %vm91_vm0 = vcmask 261120  }
  0x27   :  { %127 = vmatprep.mubr.bf16.mxu0 %v312_v0  ;;  %168 = vmatprep.mubr.bf16.mxu1 %v312_v0  ;;  %v226_v2 = vld [vmem:[#allocation5 + $0xc] ss:$16 sps:$4 sm:$0xff]   ;;  %v228_v3 = vld [vmem:[#allocation5] ss:$16 sps:$4 sm:$0xff]   ;;  %v229_v4 = vld [vmem:[#allocation5 + $0x8] ss:$16 sps:$4 sm:$0xff]  }
  0x28   :  { %95 = vmatprep.subr.bf16.mxu0 %v224_v1  ;;  %136 = vmatprep.subr.bf16.mxu1 %v226_v2  ;;  %v230_v5 = vld [vmem:[#allocation5 + $0x24] ss:$16 sps:$4 sm:$0xff]   ;;  %v232_v6 = vld [vmem:[#allocation5 + $0x2c] ss:$16 sps:$4 sm:$0xff]   ;;  %v234_v7 = vld [vmem:[#allocation5 + $0x20] ss:$16 sps:$4 sm:$0xff]  }
  0x29   :  { %96 = vmatpush1.bf16.msra.mxu0 %v228_v3  ;;  %137 = vmatpush1.bf16.msra.mxu1 %v229_v4  ;;  %v235_v8 = vld [vmem:[#allocation5 + $0x28] ss:$16 sps:$4 sm:$0xff]   ;;  %v42_v9 = vld [vmem:[#allocation2] sm:$0xf]  ;;  %vm181_vm1 = vcmask 1043456  }
  0x2a   :  { %97 = vmatprep.subr.bf16.mxu0 %v230_v5  ;;  %138 = vmatprep.subr.bf16.mxu1 %v232_v6  ;;  %v180_v10 = vld [vmem:[%s382_s2] sm:$0xf]  ;;  %s313_s2 = smov [#allocation7]  }
  0x2b   :  { %v182_v11 = vsel %vm181_vm1, %v180_v10, 0.0  ;;  %s198_s11 = sshll.u32 %s313_s2, 4  ;;  %s199_s11 = int_to_ptr.vmem [resolvable:$true] %s198_s11 }
  0x2c   :  { %v183_v12 = vrot.slane %v182_v11, 4  ;;  %s280_s12 = scalar_lea.vmem %s199_s11, 128  ;;  %p285_p3 = scmp.lt.s32.totalorder %s199_s11, %s199_s11 }
  0x2d   :  { %98 = vmatpush1.bf16.msra.mxu0 %v234_v7  ;;  %139 = vmatpush1.bf16.msra.mxu1 %v235_v8  ;;  %p281_p2 = scmp.ne.s32.totalorder %s199_s11, %s280_s12  ;;  %p286_p4 = scmp.lt.s32.totalorder %s280_s12, %s280_s12 }
  0x2e   :  { %v184_v13 = vadd.f32 %v183_v12, %v182_v11 }
  0x2f   :  { %p287_p5 = por %p286_p4, %p285_p3 }
  0x30   :  { %216 = vmatmul.mubr.msk.bf16.vlgmr.msra.gmra.mrb[0].mxu0 %vm91_vm0, %v42_v9  ;;  %217 = vmatmul.mubr.msk.bf16.vlgmr.msra.gmra.mrb[0].mxu1 %vm91_vm0, %v42_v9  ;;  %v185_v14 = vrot.slane %v184_v13, 2 }
  0x31   :  { %p288_p6 = pnand %p287_p5, %p281_p2 }
  0x32   :  { %v186_v15 = vadd.f32 %v185_v14, %v184_v13 }
  0x34   :  { %v187_v18 = vrot.slane %v186_v15, 1 }
  0x36   :  { %v188_v27 = vadd.f32 %v187_v18, %v186_v15 }
 0x103   :  { %v129_v16 = vpop.f32.mrb[0].mxu0  ;;  %v170_v17 = vpop.f32.mrb[0].mxu1 }
 0x104   :  { %v131_v19 = vpop.f32.mrb[1].mxu0  ;;  %v172_v20 = vpop.f32.mrb[1].mxu1 }
 0x105   :  { %v177_v21 = vadd.f32 %v131_v19, %v129_v16  ;;  %v133_v22 = vpop.f32.mrb[2].mxu0  ;;  %v174_v23 = vpop.f32.mrb[2].mxu1 }
 0x106   :  { %v134_v24 = vpop.f32.mrb[3].mxu0  ;;  %v175_v25 = vpop.f32.mrb[3].mxu1 }
 0x107   :  { %v178_v26 = vadd.f32 %v177_v21, %v170_v17 }
 0x109   :  { %v179_v28 = vadd.f32 %v178_v26, %v172_v20 }
 0x10b   :  { %v189_v29 = vadd.f32 %v188_v27, %v179_v28 }
 0x10d   :  { %v190_v30 = vmul.f32 0.25, %v189_v29 }
 0x10f   :  { %191 = vst [vmem:[#allocation7] sm:$0xff] %v190_v30 }
 0x110   :  { %291 = shalt.err (!%p288_p6)
}
 0x111   :  { %s292_s15 = scalar_lea.hbm %s383_s3, 128 }
 0x112   :  { %p293_p7 = scmp.ne.s32.totalorder %s383_s3, %s292_s15  ;;  %p296_p8 = scmp.lt.u32.totalorder %s292_s15, %s383_s3 }
 0x114   :  { %p298_p9 = pnand %p296_p8, %p293_p7 }
 0x116   :  { %301 = shalt.err (!%p298_p9)
}
 0x117   :  { %201 = dma.vmem_to_hbm [thread:$0]  %s199_s11, 128, %s383_s3, [#allocation4]  }
 0x118   :  { %306 = dma.done.wait [#allocation4], 128  }
 0x119   :  { %307 = vsyncadd [#allocation4], 4294967168 }
 0x11a   :  { %205 = vsyncpa [#allocation3], 1 }
 0x11b   :  { %206 = vsyncpa [#allocation6], 1 }
 0x11c   :  { %207 = vsyncpa [#allocation4], 1 }

</bundles_post_ra>
